<compile_context>
chip_gen: v6e
topology: v6e:2x2x1
jax: 0.10.0
libtpu: 0.0.40
codegen_flags: <defaults>
</compile_context>

<pallas_src>
import jax
import jax.numpy as jnp
from jax.experimental import pallas as pl
from jax.experimental.pallas import tpu as pltpu


_MIN_KERNEL_BYTES = 256 * 1024        # below this, launch overhead dwarfs the copy
_TARGET_TILE_BYTES = 4 << 20          # ~4 MiB tile -> ~16 MiB live VMEM (safe on v5e/v6e/v7x)


def _identity_kernel(x_ref, o_ref):
    # Pure pass-through of the current VMEM tile (one vld + one vst per vreg).
    o_ref[...] = x_ref[...]


def _choose_cols(n: int):
    """Widest lane-dense column count (multiple of 128) that divides n."""
    # Prefer a factorization that also leaves >= 8 rows (full sublane tiles).
    for cols in (2048, 1024, 512, 256, 128):
        if n % cols == 0 and n // cols >= 8:
            return cols
    for cols in (2048, 1024, 512, 256, 128):
        if n % cols == 0:
            return cols
    return None


def print_layer(x: jax.Array, position: str, *, force_kernel: bool = False) -> jax.Array:
    """Pallas equivalent of PrintLayer.forward: print(position, shape); return x."""
    # Host-side print of the (static) shape, matching the torch module.
    print(position, tuple(x.shape))

    if x.size == 0:
        return x

    itemsize = jnp.dtype(x.dtype).itemsize
    nbytes = x.size * itemsize

    # Tiny inputs: the op is a pure identity, skip the kernel entirely.
    if nbytes < _MIN_KERNEL_BYTES and not force_kernel:
        return x

    cols = _choose_cols(x.size)
    if cols is None:
        # No 128-multiple factor (e.g. odd element count): identity is free anyway.
        return x

    rows = x.size // cols
    # Metadata-only reshape of a contiguous array: no pad, no slice, no extra HBM pass.
    x2d = x.reshape(rows, cols)

    # Dtype-aware sublane granularity (sub-32-bit dtypes pack along sublanes).
    sublane_min = {4: 8, 2: 16, 1: 32}.get(itemsize, 8)

    max_block_rows = max(
        sublane_min,
        (_TARGET_TILE_BYTES // (cols * itemsize)) // sublane_min * sublane_min,
    )
    if rows <= max_block_rows:
        block_rows = rows               # full-dim block: always legal
    else:
        block_rows = max_block_rows     # multiple of sublane_min; ragged last block is masked

    grid = (pl.cdiv(rows, block_rows),)

    tile_bytes = block_rows * cols * itemsize
    # in + out, double-buffered = 4 x tile, plus headroom; stay well under
    # v7x's 64 MiB physical VMEM while raising v5e's 16 MiB scoped default.
    vmem_limit = int(min(max(4 * tile_bytes + (2 << 20), 16 << 20), 30 << 20))

    out2d = pl.pallas_call(
        _identity_kernel,
        out_shape=jax.ShapeDtypeStruct((rows, cols), x.dtype),
        grid_spec=pltpu.PrefetchScalarGridSpec(
            num_scalar_prefetch=0,
            grid=grid,
            in_specs=[pl.BlockSpec((block_rows, cols), lambda i: (i, 0))],
            out_specs=pl.BlockSpec((block_rows, cols), lambda i: (i, 0)),
        ),
        compiler_params=pltpu.CompilerParams(
            dimension_semantics=("parallel",),
            vmem_limit_bytes=vmem_limit,
        ),
    )(x2d)

    return out2d.reshape(x.shape)


if __name__ == "__main__":
    key = jax.random.PRNGKey(0)
    # Small NCHW-style input consistent with a conv-VAE intermediate.
    x = jax.random.normal(key, (2, 4, 16, 16), dtype=jnp.float32)

    # Exercise the Pallas kernel path (force past the small-input fast path).
    y = print_layer(x, "after_conv_block_1", force_kernel=True)
    y = jax.block_until_ready(y)
    assert y.shape == x.shape
    assert y.dtype == x.dtype
    assert bool(jnp.all(y == x))

    # Also exercise a larger, ragged-grid case (last block masked) in bf16.
    xb = jax.random.normal(key, (3, 8, 40, 96), dtype=jnp.bfloat16)
    yb = jax.block_until_ready(print_layer(xb, "encoder_feature_map", force_kernel=True))
    assert yb.shape == xb.shape and yb.dtype == xb.dtype
    assert bool(jnp.all(yb == xb))

    # Default fast path: tiny input just returns x (identity, zero cost).
    y_fast = print_layer(x, "decoder_input")
    assert bool(jnp.all(y_fast == x))

    print("KERNEL_OK")
</pallas_src>

<mosaic_0001>
module attributes {stable_mosaic.version = 11 : i64} {
  func.func @_identity_kernel(%arg0: i32, %arg1: memref<8x256xf32, #tpu.memory_space<vmem>>, %arg2: memref<8x256xf32, #tpu.memory_space<vmem>>) attributes {dimension_semantics = [#tpu.dimension_semantics<parallel>], iteration_bounds = array<i64: 1>, scalar_prefetch = 0 : i64, scratch_operands = 0 : i64, tpu.core_type = #tpu.core_type<tc>, window_params = [{transform_indices = @transform_0, window_bounds = array<i64: 8, 256>}, {transform_indices = @transform_1, window_bounds = array<i64: 8, 256>}]} {
    %c0 = arith.constant 0 : index
    %c0_0 = arith.constant 0 : index
    %0 = vector.load %arg1[%c0, %c0_0] : memref<8x256xf32, #tpu.memory_space<vmem>>, vector<8x256xf32>
    %c0_1 = arith.constant 0 : index
    %c0_2 = arith.constant 0 : index
    %1 = vector.load %arg2[%c0_1, %c0_2] : memref<8x256xf32, #tpu.memory_space<vmem>>, vector<8x256xf32>
    tpu.vector_store %arg2[%c0_1, %c0_2], %0 {strides = array<i32>} : memref<8x256xf32, #tpu.memory_space<vmem>>, vector<8x256xf32>,
    return
  }
  func.func @transform_0(%arg0: i32) -> (i32, i32) {
    %c0_i32 = arith.constant 0 : i32
    %c0_i32_0 = arith.constant 0 : i32
    return %arg0, %c0_i32 : i32, i32
  }
  func.func @transform_1(%arg0: i32) -> (i32, i32) {
    %c0_i32 = arith.constant 0 : i32
    %c0_i32_0 = arith.constant 0 : i32
    return %arg0, %c0_i32 : i32, i32
  }
}

</mosaic_0001>

<bundles_post_ra>
// kernel: tpu_custom_call.1
= control target key start
LH: loop header
LB: loop body
LE: loop exit
PB: predicated region body
PF: predicated region fallthrough
CT: control target
= control target key end

     0   :  { %6 = vsyncpa [#allocation3], 0  ;;  %s104_s0 = inlined_call_operand.hbm [shape: f32[8,256], index: 0, kind: input, shape index: {}]   ;;  %s105_s1 = inlined_call_operand.hbm [shape: f32[8,256], index: 1, kind: output, shape index: {}]  }
   0x1   :  { %7 = vsyncpa [#allocation4], 0  ;;  %s86_s6 = smov [#allocation2]  }
   0x2   :  { %s14_s7 = sshll.u32 %s86_s6, 4  ;;  %s15_s7 = int_to_ptr.vmem [resolvable:$true] %s14_s7 }
   0x3   :  { %s50_s8 = scalar_lea.vmem %s15_s7, 256  ;;  %p55_p1 = scmp.lt.s32.totalorder %s15_s7, %s15_s7 }
   0x4   :  { %p51_p0 = scmp.ne.s32.totalorder %s15_s7, %s50_s8  ;;  %p56_p2 = scmp.lt.s32.totalorder %s50_s8, %s50_s8 }
   0x6   :  { %p57_p3 = por %p56_p2, %p55_p1 }
   0x8   :  { %p58_p4 = pnand %p57_p3, %p51_p0 }
   0xa   :  { %61 = shalt.err (!%p58_p4)
}
   0xb   :  { %17 = dma.hbm_to_vmem [thread:$0]  %s104_s0, 256, %s15_s7, [#allocation3]  }
   0xc   :  { %82 = dma.done.wait [#allocation3], 256  }
   0xd   :  { %83 = vsyncadd [#allocation3], 4294967040  ;;  %s87_s11 = smov [#allocation5]   ;;  %v21_v0 = vld [vmem:[#allocation2] sm:$0xff]  ;;  %v22_v1 = vld [vmem:[#allocation2 + $0x8] sm:$0xff] }
   0xe   :  { %s31_s12 = sshll.u32 %s87_s11, 4  ;;  %23 = vst [vmem:[#allocation5] sm:$0xff] %v21_v0  ;;  %24 = vst [vmem:[#allocation5 + $0x8] sm:$0xff] %v22_v1  ;;  %s32_s12 = int_to_ptr.vmem [resolvable:$true] %s31_s12 }
   0xf   :  { %s62_s13 = scalar_lea.vmem %s32_s12, 256  ;;  %p67_p6 = scmp.lt.s32.totalorder %s32_s12, %s32_s12 }
  0x10   :  { %p63_p5 = scmp.ne.s32.totalorder %s32_s12, %s62_s13  ;;  %p68_p7 = scmp.lt.s32.totalorder %s62_s13, %s62_s13 }
  0x12   :  { %p69_p8 = por %p68_p7, %p67_p6 }
  0x14   :  { %p70_p9 = pnand %p69_p8, %p63_p5 }
  0x16   :  { %73 = shalt.err (!%p70_p9)
}
  0x17   :  { %34 = dma.vmem_to_hbm [thread:$0]  %s32_s12, 256, %s105_s1, [#allocation4]  }
  0x18   :  { %84 = dma.done.wait [#allocation4], 256  }
  0x19   :  { %85 = vsyncadd [#allocation4], 4294967040 }
  0x1a   :  { %38 = vsyncpa [#allocation3], 1 }
  0x1b   :  { %39 = vsyncpa [#allocation4], 1 }

</bundles_post_ra>
